<compile_context>
chip_gen: v5e
topology: v5e:2x2
jax: 0.10.0
libtpu: 0.0.40
codegen_flags: <defaults>
</compile_context>

<pallas_src>
import functools

import jax
import jax.numpy as jnp
import numpy as np
from jax.experimental import pallas as pl
from jax.experimental.pallas import tpu as pltpu


def mlp_attention_kernel(q_ref, a_ref, wq_ref, bq_ref, wa_ref, wv_ref,
                         watt_q_ref, watt_c_ref, batt_ref,
                         out_ref, sc_ref, ap_ref, *, tanh_dtype):
    # q_ref: (Bt, tT, H)   a_ref: (Bt, S, A)
    Bt, tT, H = q_ref.shape
    _, S, A = a_ref.shape

    # --- annotation projection: once per batch tile, kept resident in scratch ---
    @pl.when(pl.program_id(1) == 0)
    def _():
        a2d = a_ref[...].reshape(Bt * S, A)
        ap_ref[...] = jnp.dot(
            a2d, wa_ref[...], preferred_element_type=jnp.float32
        ).reshape(Bt, S, H)

    # --- query projection for this time chunk (all batch rows in one matmul) ---
    q2d = q_ref[...].reshape(Bt * tT, H)
    qp = (jnp.dot(q2d, wq_ref[...], preferred_element_type=jnp.float32)
          + bq_ref[...]).reshape(Bt, tT, H)

    ap = ap_ref[...]                                              # (Bt, S, H)

    # pre_tanh = qp.unsqueeze(2) + ap.unsqueeze(1), only for this (Bt, tT) chunk.
    pre = jnp.tanh((qp[:, :, None, :] + ap[:, None, :, :]).astype(tanh_dtype))

    # v(tanh(pre)).squeeze(-1): wv-weighted reduction over H.
    wv = wv_ref[...].astype(tanh_dtype)                           # (1, H)
    s = jnp.sum((pre * wv).astype(jnp.float32), axis=-1)          # (Bt, tT, S)

    # softmax over source positions (torch dim=2 -> last axis here)
    m = jnp.max(s, axis=-1, keepdims=True)
    e = jnp.exp(s - m)
    sc = e * pl.reciprocal(jnp.sum(e, axis=-1, keepdims=True), approx=True)

    # contexts = bmm(scores, annotations)
    a3 = a_ref[...].astype(jnp.float32)
    ctx = jnp.einsum("bts,bsa->bta", sc, a3,
                     preferred_element_type=jnp.float32)          # (Bt, tT, A)

    # attend(cat([queries, contexts], -1)) with the concat folded into two matmuls
    # (dropout is identity in eval mode)
    att = (jnp.dot(q2d, watt_q_ref[...], preferred_element_type=jnp.float32)
           + jnp.dot(ctx.reshape(Bt * tT, A), watt_c_ref[...],
                     preferred_element_type=jnp.float32)
           + batt_ref[...])                                       # (Bt*tT, H)
    out_ref[...] = jnp.tanh(att).reshape(Bt, tT, H).astype(out_ref.dtype)
    sc_ref[...] = sc.astype(sc_ref.dtype)


def _vmem_estimate_bytes(bt, tt, S, H, A):
    f = 4  # float32
    pre = bt * tt * S * H * f            # tanh chunk (vreg/VMEM resident)
    qblk = 2 * bt * tt * H * f           # double-buffered query block
    ablk = 2 * bt * S * A * f            # double-buffered annotation block
    oblk = 2 * bt * tt * H * f           # double-buffered output block
    sblk = 2 * bt * tt * S * f           # double-buffered scores block
    scr = bt * S * H * f                 # annotation-projection scratch
    return pre + qblk + ablk + oblk + sblk + scr


def _pick_tiles(B, T, S, H, A, vmem_budget=32 * 1024 * 1024):
    """Pick (Bt, tT) so the per-step working set fits a conservative VMEM budget
    (also valid on v7x's 64 MiB VMEM)."""
    # tT candidates: full T, else divisors of T that are multiples of 8.
    tts = [T] + [d for d in range(8 * (T // 8), 0, -8) if d != T and T % d == 0]
    bts = [d for d in range(B, 0, -1) if B % d == 0]
    feasible = [(bt, tt) for bt in bts for tt in tts
                if _vmem_estimate_bytes(bt, tt, S, H, A) <= vmem_budget]
    if not feasible:
        return 1, min(tts)

    def key(p):
        bt, tt = p
        rows = bt * tt
        # Prefer configs that leave >=2 batch-tiles for megacore (v7x) once the
        # matmul rows are already reasonably large; otherwise maximize folding.
        two_cores = (B // bt) >= 2 and rows >= 64
        return (two_cores, min(rows, 512), rows)

    return max(feasible, key=key)


def mlp_attention(queries, annotations, params, *, tanh_dtype=jnp.float32,
                  interpret=False):
    """queries: (T, B, H); annotations: (S, B, A) -> ((T, B, H), (T, B, S))."""
    T, B, H = queries.shape
    S, _, A = annotations.shape

    # permute(1, 0, 2) -> batch-major
    q = jnp.transpose(queries, (1, 0, 2))        # (B, T, H)
    a = jnp.transpose(annotations, (1, 0, 2))    # (B, S, A)

    # Pre-transpose linear weights so the kernel does plain x @ W.
    wq_t = params["wq"].T                        # (H, H)
    bq = params["bq"].reshape(1, H)              # (1, H)
    wa_t = params["wa"].T                        # (A, H)
    wv = params["wv"].reshape(1, H)              # (1, H)
    watt = params["watt"]                        # (H, H + A)
    watt_q_t = watt[:, :H].T                     # (H, H)
    watt_c_t = watt[:, H:].T                     # (A, H)
    batt = params["batt"].reshape(1, H)          # (1, H)

    Bt, tT = _pick_tiles(B, T, S, H, A)
    grid = (B // Bt, T // tT)

    kernel = functools.partial(mlp_attention_kernel, tanh_dtype=tanh_dtype)
    shared2d = lambda shape: pl.BlockSpec(shape, lambda b, t: (0, 0))

    out, scores = pl.pallas_call(
        kernel,
        out_shape=(jax.ShapeDtypeStruct((B, T, H), jnp.float32),
                   jax.ShapeDtypeStruct((B, T, S), jnp.float32)),
        grid_spec=pltpu.PrefetchScalarGridSpec(
            num_scalar_prefetch=0,
            grid=grid,
            in_specs=[
                pl.BlockSpec((Bt, tT, H), lambda b, t: (b, t, 0)),   # queries
                pl.BlockSpec((Bt, S, A), lambda b, t: (b, 0, 0)),    # annotations
                shared2d((H, H)),          # wq_t
                shared2d((1, H)),          # bq
                shared2d((A, H)),          # wa_t
                shared2d((1, H)),          # wv
                shared2d((H, H)),          # watt_q_t
                shared2d((A, H)),          # watt_c_t
                shared2d((1, H)),          # batt
            ],
            out_specs=[
                pl.BlockSpec((Bt, tT, H), lambda b, t: (b, t, 0)),   # states
                pl.BlockSpec((Bt, tT, S), lambda b, t: (b, t, 0)),   # scores
            ],
            scratch_shapes=[pltpu.VMEM((Bt, S, H), jnp.float32)],    # ap cache
        ),
        compiler_params=pltpu.CompilerParams(
            dimension_semantics=("parallel", "arbitrary"),
            vmem_limit_bytes=48 * 1024 * 1024,
        ),
        interpret=interpret,
    )(q, a, wq_t, bq, wa_t, wv, watt_q_t, watt_c_t, batt)

    # permute back to time-major, matching torch .permute(1, 0, 2)
    return jnp.transpose(out, (1, 0, 2)), jnp.transpose(scores, (1, 0, 2))


def mlp_attention_ref(queries, annotations, params):
    """Pure-JAX reference mirroring the PyTorch forward (eval mode)."""
    q = jnp.transpose(queries, (1, 0, 2))
    a = jnp.transpose(annotations, (1, 0, 2))
    qp = q @ params["wq"].T + params["bq"]
    ap = a @ params["wa"].T
    pre = jnp.tanh(qp[:, :, None, :] + ap[:, None, :, :])
    s = jnp.einsum("btsh,h->bts", pre, params["wv"].reshape(-1))
    sc = jax.nn.softmax(s, axis=2)
    ctx = jnp.einsum("bts,bsa->bta", sc, a)
    att_in = jnp.concatenate([q, ctx], axis=-1)
    out = jnp.tanh(att_in @ params["watt"].T + params["batt"])
    return jnp.transpose(out, (1, 0, 2)), jnp.transpose(sc, (1, 0, 2))


if __name__ == "__main__":
    # Small shapes consistent with the module's forward signature.
    tgt_len, src_len, batch = 8, 8, 2
    hidden_dim, annotation_dim = 32, 32

    key = jax.random.PRNGKey(0)
    ks = jax.random.split(key, 8)

    queries = jax.random.normal(ks[0], (tgt_len, batch, hidden_dim), jnp.float32)
    annotations = jax.random.normal(ks[1], (src_len, batch, annotation_dim), jnp.float32)

    # Deterministic parameter init (shapes from the module __init__).
    params = {
        "wq": 0.05 * jax.random.normal(ks[2], (hidden_dim, hidden_dim), jnp.float32),
        "bq": jnp.zeros((hidden_dim,), jnp.float32),
        "wa": 0.05 * jax.random.normal(ks[3], (hidden_dim, annotation_dim), jnp.float32),
        "wv": 0.1 * jax.random.normal(ks[4], (1, hidden_dim), jnp.float32),
        "watt": 0.1 * jax.random.normal(
            ks[5], (hidden_dim, hidden_dim + annotation_dim), jnp.float32),
        "batt": jnp.zeros((hidden_dim,), jnp.float32),
    }
    # TODO(synk): dropout implemented as eval-mode identity (no RNG mask in kernel).

    out, scores = mlp_attention(queries, annotations, params)
    jax.block_until_ready((out, scores))

    ref_out, ref_scores = mlp_attention_ref(queries, annotations, params)
    # Tolerance loosened slightly vs. 1e-5 because the softmax normalization now
    # uses the EUP approximate reciprocal (pl.reciprocal(approx=True)).
    np.testing.assert_allclose(np.asarray(out), np.asarray(ref_out),
                               rtol=1e-3, atol=1e-3)
    np.testing.assert_allclose(np.asarray(scores), np.asarray(ref_scores),
                               rtol=1e-3, atol=1e-3)

    print("KERNEL_OK")
</pallas_src>

<mosaic_0001>
module attributes {stable_mosaic.version = 11 : i64} {
  func.func @mlp_attention_kernel(%arg0: i32, %arg1: i32, %arg2: memref<2x8x32xf32, #tpu.memory_space<vmem>>, %arg3: memref<2x8x32xf32, #tpu.memory_space<vmem>>, %arg4: memref<32x32xf32, #tpu.memory_space<vmem>>, %arg5: memref<1x32xf32, #tpu.memory_space<vmem>>, %arg6: memref<32x32xf32, #tpu.memory_space<vmem>>, %arg7: memref<1x32xf32, #tpu.memory_space<vmem>>, %arg8: memref<32x32xf32, #tpu.memory_space<vmem>>, %arg9: memref<32x32xf32, #tpu.memory_space<vmem>>, %arg10: memref<1x32xf32, #tpu.memory_space<vmem>>, %arg11: memref<2x8x32xf32, #tpu.memory_space<vmem>>, %arg12: memref<2x8x8xf32, #tpu.memory_space<vmem>>, %arg13: memref<2x8x32xf32, #tpu.memory_space<vmem>>) attributes {dimension_semantics = [#tpu.dimension_semantics<parallel>, #tpu.dimension_semantics<arbitrary>], iteration_bounds = array<i64: 1, 1>, scalar_prefetch = 0 : i64, scratch_operands = 1 : i64, tpu.core_type = #tpu.core_type<tc>, window_params = [{transform_indices = @transform_0, window_bounds = array<i64: 2, 8, 32>}, {transform_indices = @transform_1, window_bounds = array<i64: 2, 8, 32>}, {pipeline_mode = #tpu.pipeline_mode<synchronous>, transform_indices = @transform_2, window_bounds = array<i64: 32, 32>}, {pipeline_mode = #tpu.pipeline_mode<synchronous>, transform_indices = @transform_3, window_bounds = array<i64: 1, 32>}, {pipeline_mode = #tpu.pipeline_mode<synchronous>, transform_indices = @transform_4, window_bounds = array<i64: 32, 32>}, {pipeline_mode = #tpu.pipeline_mode<synchronous>, transform_indices = @transform_5, window_bounds = array<i64: 1, 32>}, {pipeline_mode = #tpu.pipeline_mode<synchronous>, transform_indices = @transform_6, window_bounds = array<i64: 32, 32>}, {pipeline_mode = #tpu.pipeline_mode<synchronous>, transform_indices = @transform_7, window_bounds = array<i64: 32, 32>}, {pipeline_mode = #tpu.pipeline_mode<synchronous>, transform_indices = @transform_8, window_bounds = array<i64: 1, 32>}, {transform_indices = @transform_9, window_bounds = array<i64: 2, 8, 32>}, {transform_indices = @transform_10, window_bounds = array<i64: 2, 8, 8>}]} {
    %c0_i32 = arith.constant 0 : i32
    %0 = arith.cmpi eq, %arg1, %c0_i32 : i32
    %1 = arith.extui %0 : i1 to i32
    %c0_i32_0 = arith.constant 0 : i32
    %2 = arith.cmpi ne, %1, %c0_i32_0 : i32
    scf.if %2 {
      %c0_33 = arith.constant 0 : index
      %c0_34 = arith.constant 0 : index
      %c0_35 = arith.constant 0 : index
      %48 = vector.load %arg3[%c0_33, %c0_34, %c0_35] : memref<2x8x32xf32, #tpu.memory_space<vmem>>, vector<2x8x32xf32>
      %49 = vector.shape_cast %48 : vector<2x8x32xf32> to vector<16x32xf32>
      %c0_36 = arith.constant 0 : index
      %c0_37 = arith.constant 0 : index
      %50 = vector.load %arg6[%c0_36, %c0_37] : memref<32x32xf32, #tpu.memory_space<vmem>>, vector<32x32xf32>
      %cst_38 = arith.constant dense<0.000000e+00> : vector<16x32xf32>
      %51 = tpu.matmul %49, %50, %cst_38 {dimension_numbers = #tpu.dot_dimension_numbers<[1], [0], [0], [1], [0, 0, 1, 1], [], []>} : vector<16x32xf32>, vector<32x32xf32>, vector<16x32xf32> -> vector<16x32xf32>
      %52 = vector.shape_cast %51 : vector<16x32xf32> to vector<2x8x32xf32>
      %c0_39 = arith.constant 0 : index
      %c0_40 = arith.constant 0 : index
      %c0_41 = arith.constant 0 : index
      %53 = vector.load %arg13[%c0_39, %c0_40, %c0_41] : memref<2x8x32xf32, #tpu.memory_space<vmem>>, vector<2x8x32xf32>
      tpu.vector_store %arg13[%c0_39, %c0_40, %c0_41], %52 {strides = array<i32>} : memref<2x8x32xf32, #tpu.memory_space<vmem>>, vector<2x8x32xf32>,
    } else {
    }
    %c0 = arith.constant 0 : index
    %c0_1 = arith.constant 0 : index
    %c0_2 = arith.constant 0 : index
    %3 = vector.load %arg2[%c0, %c0_1, %c0_2] : memref<2x8x32xf32, #tpu.memory_space<vmem>>, vector<2x8x32xf32>
    %4 = vector.shape_cast %3 : vector<2x8x32xf32> to vector<16x32xf32>
    %c0_3 = arith.constant 0 : index
    %c0_4 = arith.constant 0 : index
    %5 = vector.load %arg4[%c0_3, %c0_4] : memref<32x32xf32, #tpu.memory_space<vmem>>, vector<32x32xf32>
    %cst = arith.constant dense<0.000000e+00> : vector<16x32xf32>
    %6 = tpu.matmul %4, %5, %cst {dimension_numbers = #tpu.dot_dimension_numbers<[1], [0], [0], [1], [0, 0, 1, 1], [], []>} : vector<16x32xf32>, vector<32x32xf32>, vector<16x32xf32> -> vector<16x32xf32>
    %c0_5 = arith.constant 0 : index
    %c0_6 = arith.constant 0 : index
    %7 = vector.load %arg5[%c0_5, %c0_6] : memref<1x32xf32, #tpu.memory_space<vmem>>, vector<1x32xf32>
    %8 = vector.broadcast %7 : vector<1x32xf32> to vector<16x32xf32>
    %9 = arith.addf %6, %8 : vector<16x32xf32>
    %10 = vector.shape_cast %9 : vector<16x32xf32> to vector<2x8x32xf32>
    %c0_7 = arith.constant 0 : index
    %c0_8 = arith.constant 0 : index
    %c0_9 = arith.constant 0 : index
    %11 = vector.load %arg13[%c0_7, %c0_8, %c0_9] : memref<2x8x32xf32, #tpu.memory_space<vmem>>, vector<2x8x32xf32>
    %12 = vector.shape_cast %10 : vector<2x8x32xf32> to vector<2x8x1x32xf32>
    %13 = vector.shape_cast %11 : vector<2x8x32xf32> to vector<2x1x8x32xf32>
    %14 = vector.broadcast %12 : vector<2x8x1x32xf32> to vector<2x8x8x32xf32>
    %15 = vector.broadcast %13 : vector<2x1x8x32xf32> to vector<2x8x8x32xf32>
    %16 = arith.addf %14, %15 : vector<2x8x8x32xf32>
    %17 = math.tanh %16 : vector<2x8x8x32xf32>
    %c0_10 = arith.constant 0 : index
    %c0_11 = arith.constant 0 : index
    %18 = vector.load %arg7[%c0_10, %c0_11] : memref<1x32xf32, #tpu.memory_space<vmem>>, vector<1x32xf32>
    %19 = vector.shape_cast %18 : vector<1x32xf32> to vector<1x1x1x32xf32>
    %20 = vector.broadcast %19 : vector<1x1x1x32xf32> to vector<2x8x8x32xf32>
    %21 = arith.mulf %17, %20 : vector<2x8x8x32xf32>
    %cst_12 = arith.constant dense<0.000000e+00> : vector<2x8x8xf32>
    %22 = vector.multi_reduction <add>, %21, %cst_12 [3] : vector<2x8x8x32xf32> to vector<2x8x8xf32>
    %cst_13 = arith.constant dense<0xFF800000> : vector<2x8xf32>
    %23 = vector.multi_reduction <maximumf>, %22, %cst_13 [2] : vector<2x8x8xf32> to vector<2x8xf32>
    %24 = vector.shape_cast %23 : vector<2x8xf32> to vector<2x8x1xf32>
    %25 = vector.broadcast %24 : vector<2x8x1xf32> to vector<2x8x8xf32>
    %26 = arith.subf %22, %25 : vector<2x8x8xf32>
    %27 = math.exp %26 : vector<2x8x8xf32>
    %cst_14 = arith.constant dense<0.000000e+00> : vector<2x8xf32>
    %28 = vector.multi_reduction <add>, %27, %cst_14 [2] : vector<2x8x8xf32> to vector<2x8xf32>
    %29 = vector.shape_cast %28 : vector<2x8xf32> to vector<2x8x1xf32>
    %30 = tpu.reciprocal %29 {approx = true} : vector<2x8x1xf32> -> vector<2x8x1xf32>
    %31 = vector.broadcast %30 : vector<2x8x1xf32> to vector<2x8x8xf32>
    %32 = arith.mulf %27, %31 : vector<2x8x8xf32>
    %c0_15 = arith.constant 0 : index
    %c0_16 = arith.constant 0 : index
    %c0_17 = arith.constant 0 : index
    %33 = vector.load %arg3[%c0_15, %c0_16, %c0_17] : memref<2x8x32xf32, #tpu.memory_space<vmem>>, vector<2x8x32xf32>
    "tpu.trace_start"() <{level = 10 : i32, message = "bts,bsa->bta"}> : () -> ()
    %cst_18 = arith.constant dense<0.000000e+00> : vector<2x8x32xf32>
    %34 = tpu.matmul %32, %33, %cst_18 {dimension_numbers = #tpu.dot_dimension_numbers<[2], [1], [1], [2], [0, 0, 0, 1, 1, 2], [0], [0]>} : vector<2x8x8xf32>, vector<2x8x32xf32>, vector<2x8x32xf32> -> vector<2x8x32xf32>
    "tpu.trace_stop"() : () -> ()
    %c0_19 = arith.constant 0 : index
    %c0_20 = arith.constant 0 : index
    %35 = vector.load %arg8[%c0_19, %c0_20] : memref<32x32xf32, #tpu.memory_space<vmem>>, vector<32x32xf32>
    %cst_21 = arith.constant dense<0.000000e+00> : vector<16x32xf32>
    %36 = tpu.matmul %4, %35, %cst_21 {dimension_numbers = #tpu.dot_dimension_numbers<[1], [0], [0], [1], [0, 0, 1, 1], [], []>} : vector<16x32xf32>, vector<32x32xf32>, vector<16x32xf32> -> vector<16x32xf32>
    %37 = vector.shape_cast %34 : vector<2x8x32xf32> to vector<16x32xf32>
    %c0_22 = arith.constant 0 : index
    %c0_23 = arith.constant 0 : index
    %38 = vector.load %arg9[%c0_22, %c0_23] : memref<32x32xf32, #tpu.memory_space<vmem>>, vector<32x32xf32>
    %cst_24 = arith.constant dense<0.000000e+00> : vector<16x32xf32>
    %39 = tpu.matmul %37, %38, %cst_24 {dimension_numbers = #tpu.dot_dimension_numbers<[1], [0], [0], [1], [0, 0, 1, 1], [], []>} : vector<16x32xf32>, vector<32x32xf32>, vector<16x32xf32> -> vector<16x32xf32>
    %40 = arith.addf %36, %39 : vector<16x32xf32>
    %c0_25 = arith.constant 0 : index
    %c0_26 = arith.constant 0 : index
    %41 = vector.load %arg10[%c0_25, %c0_26] : memref<1x32xf32, #tpu.memory_space<vmem>>, vector<1x32xf32>
    %42 = vector.broadcast %41 : vector<1x32xf32> to vector<16x32xf32>
    %43 = arith.addf %40, %42 : vector<16x32xf32>
    %44 = math.tanh %43 : vector<16x32xf32>
    %45 = vector.shape_cast %44 : vector<16x32xf32> to vector<2x8x32xf32>
    %c0_27 = arith.constant 0 : index
    %c0_28 = arith.constant 0 : index
    %c0_29 = arith.constant 0 : index
    %46 = vector.load %arg11[%c0_27, %c0_28, %c0_29] : memref<2x8x32xf32, #tpu.memory_space<vmem>>, vector<2x8x32xf32>
    tpu.vector_store %arg11[%c0_27, %c0_28, %c0_29], %45 {strides = array<i32>} : memref<2x8x32xf32, #tpu.memory_space<vmem>>, vector<2x8x32xf32>,
    %c0_30 = arith.constant 0 : index
    %c0_31 = arith.constant 0 : index
    %c0_32 = arith.constant 0 : index
    %47 = vector.load %arg12[%c0_30, %c0_31, %c0_32] : memref<2x8x8xf32, #tpu.memory_space<vmem>>, vector<2x8x8xf32>
    tpu.vector_store %arg12[%c0_30, %c0_31, %c0_32], %32 {strides = array<i32>} : memref<2x8x8xf32, #tpu.memory_space<vmem>>, vector<2x8x8xf32>,
    return
  }
  func.func @transform_0(%arg0: i32, %arg1: i32) -> (i32, i32, i32) {
    %c0_i32 = arith.constant 0 : i32
    %c0_i32_0 = arith.constant 0 : i32
    return %arg0, %arg1, %c0_i32 : i32, i32, i32
  }
  func.func @transform_1(%arg0: i32, %arg1: i32) -> (i32, i32, i32) {
    %c0_i32 = arith.constant 0 : i32
    %c0_i32_0 = arith.constant 0 : i32
    %c0_i32_1 = arith.constant 0 : i32
    return %arg0, %c0_i32, %c0_i32_0 : i32, i32, i32
  }
  func.func @transform_2(%arg0: i32, %arg1: i32) -> (i32, i32) {
    %c0_i32 = arith.constant 0 : i32
    %c0_i32_0 = arith.constant 0 : i32
    %c0_i32_1 = arith.constant 0 : i32
    return %c0_i32, %c0_i32_0 : i32, i32
  }
  func.func @transform_3(%arg0: i32, %arg1: i32) -> (i32, i32) {
    %c0_i32 = arith.constant 0 : i32
    %c0_i32_0 = arith.constant 0 : i32
    %c0_i32_1 = arith.constant 0 : i32
    return %c0_i32, %c0_i32_0 : i32, i32
  }
  func.func @transform_4(%arg0: i32, %arg1: i32) -> (i32, i32) {
    %c0_i32 = arith.constant 0 : i32
    %c0_i32_0 = arith.constant 0 : i32
    %c0_i32_1 = arith.constant 0 : i32
    return %c0_i32, %c0_i32_0 : i32, i32
  }
  func.func @transform_5(%arg0: i32, %arg1: i32) -> (i32, i32) {
    %c0_i32 = arith.constant 0 : i32
    %c0_i32_0 = arith.constant 0 : i32
    %c0_i32_1 = arith.constant 0 : i32
    return %c0_i32, %c0_i32_0 : i32, i32
  }
  func.func @transform_6(%arg0: i32, %arg1: i32) -> (i32, i32) {
    %c0_i32 = arith.constant 0 : i32
    %c0_i32_0 = arith.constant 0 : i32
    %c0_i32_1 = arith.constant 0 : i32
    return %c0_i32, %c0_i32_0 : i32, i32
  }
  func.func @transform_7(%arg0: i32, %arg1: i32) -> (i32, i32) {
    %c0_i32 = arith.constant 0 : i32
    %c0_i32_0 = arith.constant 0 : i32
    %c0_i32_1 = arith.constant 0 : i32
    return %c0_i32, %c0_i32_0 : i32, i32
  }
  func.func @transform_8(%arg0: i32, %arg1: i32) -> (i32, i32) {
    %c0_i32 = arith.constant 0 : i32
    %c0_i32_0 = arith.constant 0 : i32
    %c0_i32_1 = arith.constant 0 : i32
    return %c0_i32, %c0_i32_0 : i32, i32
  }
  func.func @transform_9(%arg0: i32, %arg1: i32) -> (i32, i32, i32) {
    %c0_i32 = arith.constant 0 : i32
    %c0_i32_0 = arith.constant 0 : i32
    return %arg0, %arg1, %c0_i32 : i32, i32, i32
  }
  func.func @transform_10(%arg0: i32, %arg1: i32) -> (i32, i32, i32) {
    %c0_i32 = arith.constant 0 : i32
    %c0_i32_0 = arith.constant 0 : i32
    return %arg0, %arg1, %c0_i32 : i32, i32, i32
  }
}

</mosaic_0001>

<bundles_post_ra>
// kernel: tpu_custom_call.1
= control target key start
LH: loop header
LB: loop body
LE: loop exit
PB: predicated region body
PF: predicated region fallthrough
CT: control target
= control target key end

     0   :  { %16 = vsyncpa [#allocation4], 0  ;;  %s1636_s0 = inlined_call_operand.hbm [shape: f32[2,8,32], index: 0, kind: input, shape index: {}]   ;;  %s1637_s1 = inlined_call_operand.hbm [shape: f32[2,8,32], index: 1, kind: input, shape index: {}]   ;;  %s1638_s2 = inlined_call_operand.hbm [shape: f32[32,32], index: 2, kind: input, shape index: {}]   ;;  %s1639_s3 = inlined_call_operand.vmem [shape: f32[1,32], index: 3, kind: input, shape index: {}]   ;;  %s1640_s4 = inlined_call_operand.hbm [shape: f32[32,32], index: 4, kind: input, shape index: {}]   ;;  %s1641_s5 = inlined_call_operand.vmem [shape: f32[1,32], index: 5, kind: input, shape index: {}]   ;;  %s1642_s6 = inlined_call_operand.hbm [shape: f32[32,32], index: 6, kind: input, shape index: {}]   ;;  %s1643_s7 = inlined_call_operand.hbm [shape: f32[32,32], index: 7, kind: input, shape index: {}]   ;;  %s1644_s8 = inlined_call_operand.vmem [shape: f32[1,32], index: 8, kind: input, shape index: {}]   ;;  %s1645_s9 = inlined_call_operand.hbm [shape: f32[2,8,32], index: 9, kind: output, shape index: {0}]   ;;  %s1646_s10 = inlined_call_operand.hbm [shape: f32[2,8,8], index: 10, kind: output, shape index: {1}]  }
   0x1   :  { %17 = vsyncpa [#allocation7], 0 }
   0x2   :  { %18 = vsyncpa [#allocation10], 0 }
   0x3   :  { %19 = vsyncpa [#allocation13], 0 }
   0x4   :  { %20 = vsyncpa [#allocation5], 0 }
   0x5   :  { %21 = vsyncpa [#allocation16], 0  ;;  %s39_s15 = sshll.u32 %s1637_s1, 4  ;;  %s1219_s16 = smov [#allocation6]   ;;  %s40_s15 = int_to_ptr.hbm [resolvable:$true] %s39_s15 }
   0x6   :  { %s41_s17 = sshll.u32 %s1219_s16, 4  ;;  %s67_s20 = sshll.u32 %s1640_s4, 4  ;;  %s42_s17 = int_to_ptr.vmem [resolvable:$true] %s41_s17  ;;  %s68_s20 = int_to_ptr.hbm [resolvable:$true] %s67_s20 }
   0x7   :  { %s1220_s21 = smov 128   ;;  %s1221_s22 = smov 8  }
   0x8   :  { %47 = dma.hbm_to_vmem [thread:$0]  %s40_s15, 256, %s42_s17, [#allocation7], %s1220_s21, %s1220_s21, %s1221_s22  }
   0x9   :  { %s1222_s23 = smov [#allocation9]   ;;  %s26_s1 = sshll.u32 %s1636_s0, 4  ;;  %s27_s1 = int_to_ptr.hbm [resolvable:$true] %s26_s1 }
   0xa   :  { %s69_s24 = sshll.u32 %s1222_s23, 4  ;;  %s52_s28 = sshll.u32 %s1638_s2, 4  ;;  %s70_s24 = int_to_ptr.vmem [resolvable:$true] %s69_s24  ;;  %s53_s28 = int_to_ptr.hbm [resolvable:$true] %s52_s28 }
   0xb   :  { %75 = dma.hbm_to_vmem [thread:$0]  %s68_s20, 512, %s70_s24, [#allocation10], %s1220_s21, %s1220_s21, %s1221_s22  }
   0xc   :  { %s1223_s29 = smov [#allocation3]   ;;  %s1224_s11 = smov [#allocation8]  }
   0xd   :  { %s28_s30 = sshll.u32 %s1223_s29, 4  ;;  %s54_s0 = sshll.u32 %s1224_s11, 4  ;;  %s29_s30 = int_to_ptr.vmem [resolvable:$true] %s28_s30  ;;  %s55_s0 = int_to_ptr.vmem [resolvable:$true] %s54_s0 }
   0xe   :  { %34 = dma.hbm_to_vmem [thread:$0]  %s27_s1, 256, %s29_s30, [#allocation4], %s1220_s21, %s1220_s21, %s1221_s22  }
   0xf   :  { %s82_s14 = sshll.u32 %s1642_s6, 4  ;;  %s95_s16 = sshll.u32 %s1643_s7, 4  ;;  %s83_s14 = int_to_ptr.hbm [resolvable:$true] %s82_s14  ;;  %s96_s16 = int_to_ptr.hbm [resolvable:$true] %s95_s16 }
  0x10   :  { %60 = dma.hbm_to_vmem [thread:$0]  %s53_s28, 512, %s55_s0, [#allocation7], %s1220_s21, %s1220_s21, %s1221_s22  }
  0x11   :  { %s1225_s17 = smov [#allocation11]   ;;  %s1226_s19 = smov [#allocation12]  }
  0x12   :  { %s84_s18 = sshll.u32 %s1225_s17, 4  ;;  %s97_s6 = sshll.u32 %s1226_s19, 4  ;;  %s85_s18 = int_to_ptr.vmem [resolvable:$true] %s84_s18  ;;  %s98_s6 = int_to_ptr.vmem [resolvable:$true] %s97_s6 }
  0x13   :  { %90 = dma.hbm_to_vmem [thread:$0]  %s83_s14, 512, %s85_s18, [#allocation10], %s1220_s21, %s1220_s21, %s1221_s22  }
  0x14   :  { %103 = dma.hbm_to_vmem [thread:$0]  %s96_s16, 512, %s98_s6, [#allocation13], %s1220_s21, %s1220_s21, %s1221_s22  }
  0x15   :  { %1207 = dma.done.wait [#allocation4], 256  }
  0x16   :  { %1208 = vsyncadd [#allocation4], 4294967040 }
  0x17   :  { %1209 = dma.done.wait [#allocation7], 768  }
  0x18   :  { %1210 = vsyncadd [#allocation7], 4294966528 }
  0x19   :  { %1211 = dma.done.wait [#allocation10], 1024  }
  0x1a   :  { %1212 = vsyncadd [#allocation10], 4294966272 }
  0x1b   :  { %1213 = dma.done.wait [#allocation13], 512  }
  0x1c   :  { %1214 = vsyncadd [#allocation13], 4294966784  ;;  %v139_v0 = vld [vmem:[#allocation9 + $0x18] sm:$0xff]  ;;  %v138_v1 = vld [vmem:[#allocation9 + $0x10] sm:$0xff]  ;;  %vm140_vm0 = vcmask 261120   ;;  %vm396_vm1 = vcmask 1041409  }
  0x1d   :  { %v177_v2 = vld [vmem:[#allocation8 + $0x18] sm:$0xff]  ;;  %159 = vmatpush.msra.mxu0 %v139_v0  ;;  %v176_v3 = vld [vmem:[#allocation8 + $0x10] sm:$0xff]  ;;  %v137_v4 = vld [vmem:[#allocation9 + $0x8] sm:$0xff]  ;;  %vm398_vm2 = vcmask 1042434   ;;  %vm400_vm3 = vcmask 1043459   ;;  %vm402_vm4 = vcmask 1044484  }
  0x1e   :  { %201 = vmatpush.msra.mxu1 %v177_v2  ;;  %v136_v5 = vld [vmem:[#allocation9] sm:$0xff]  ;;  %v175_v6 = vld [vmem:[#allocation8 + $0x8] sm:$0xff]  ;;  %v134_v7 = vld [vmem:[#allocation6] sm:$0xff]  ;;  %vm404_vm5 = vcmask 1045509   ;;  %vm406_vm6 = vcmask 1046534   ;;  %vm408_vm7 = vcmask 1047559  }
  0x1f   :  { %160 = vmatpush.msra.mxu0 %v138_v1  ;;  %v174_v8 = vld [vmem:[#allocation8] sm:$0xff]  ;;  %v135_v9 = vld [vmem:[#allocation6 + $0x8] sm:$0xff]  ;;  %728 = vmatpush.msra.mxu2 %v134_v7  ;;  %v1326_v11 = vld [vmem:[#allocation3 + $0x8] sm:$0xff]  ;;  %vm419_vm8 = vcmask 64512   ;;  %s895_s1 = sshll.u32 %s1646_s10, 4  ;;  %s1229_s10 = smov [#allocation14]   ;;  %s896_s1 = int_to_ptr.hbm [resolvable:$true] %s895_s1 }
  0x20   :  { %202 = vmatpush.msra.mxu1 %v176_v3  ;;  %797 = vmatpush.msra.mxu3 %v135_v9  ;;  %v1321_v10 = vld [vmem:[#allocation3] sm:$0xff]  ;;  %v940_v12 = vld [vmem:[%s1639_s3] ss:$0 sm:$0xff]  ;;  %s880_s28 = sshll.u32 %s1229_s10, 4  ;;  %s882_s11 = sshll.u32 %s1645_s9, 4  ;;  %s881_s28 = int_to_ptr.vmem [resolvable:$true] %s880_s28  ;;  %s883_s11 = int_to_ptr.hbm [resolvable:$true] %s882_s11 }
  0x21   :  { %161 = vmatpush.msra.mxu0 %v137_v4  ;;  %v1342_v40 = vld [vmem:[%s1641_s5] ss:$0 sm:$0xff]  ;;  %s1228_s5 = smov [#allocation15]  }
  0x22   :  { %203 = vmatpush.msra.mxu1 %v175_v6  ;;  %s893_s24 = sshll.u32 %s1228_s5, 4  ;;  %s894_s24 = int_to_ptr.vmem [resolvable:$true] %s893_s24 }
  0x23   :  { %162 = vmatpush.msra.mxu0 %v136_v5 }
  0x24   :  { %204 = vmatpush.msra.mxu1 %v174_v8  ;;  %916 = vmatmul.msk.f32.vlgmr.msra.gmra.mxu0 %vm140_vm0, %v134_v7 }
  0x25   :  { %918 = vmatmul.msk.f32.vlgmr.msra.gmra.mxu1 %vm140_vm0, %v1321_v10 }
  0x2c   :  { %917 = vmatmul.msk.f32.gmra.mxu0 %vm140_vm0, %v135_v9 }
  0x2d   :  { %919 = vmatmul.msk.f32.gmra.mxu1 %vm140_vm0, %v1326_v11 }
  0xa1   :  { %v164_v13 = vpop.f32.mrf.mxu0 }
  0xa2   :  { %v206_v14 = vpop.f32.mrf.mxu1  ;;  %170 = vst.msk [vmem:[#allocation2] sm:$0xff] %vm140_vm0, %v164_v13 }
  0xa3   :  { %v207_v15 = vadd.f32 %v940_v12, %v206_v14 }
  0xa5   :  { %v219_v16 = vrot.slane %v207_v15, 4  ;;  %v217_v17 = vrot.slane %v207_v15, 2  ;;  %v220_v18 = vrot.slane %v207_v15, 5  ;;  %v218_v19 = vrot.slane %v207_v15, 3 }
  0xa6   :  { %v216_v20 = vrot.slane %v207_v15, 1  ;;  %v230_v23 = vperm.slane %v207_v15, 0  ;;  %v222_v36 = vrot.slane %v207_v15, 7  ;;  %v221_v38 = vrot.slane %v207_v15, 6 }
  0xa7   :  { %v234_v21 = vperm.slane %v219_v16, 0  ;;  %v232_v22 = vperm.slane %v217_v17, 0  ;;  %v235_v24 = vperm.slane %v220_v18, 0  ;;  %v233_v28 = vperm.slane %v218_v19, 0 }
  0xa8   :  { %v231_v29 = vperm.slane %v216_v20, 0  ;;  %v237_v41 = vperm.slane %v222_v36, 0  ;;  %v236_v44 = vperm.slane %v221_v38, 0 }
  0xa9   :  { %v212_v25 = vld [vmem:[#allocation2] sm:$0xff]  ;;  %v167_v26 = vpop.f32.mrf.mxu0 }
  0xaa   :  { %v209_v27 = vpop.f32.mrf.mxu1  ;;  %v266_v30 = vadd.f32 %v234_v21, %v212_v25  ;;  %v264_v31 = vadd.f32 %v232_v22, %v212_v25  ;;  %v262_v32 = vadd.f32 %v230_v23, %v212_v25  ;;  %171 = vst.msk [vmem:[#allocation2 + $0x8] sm:$0xff] %vm140_vm0, %v167_v26  ;;  %v267_v34 = vadd.f32 %v235_v24, %v212_v25 }
  0xab   :  { %v1336_v33 = vadd.f32 %v940_v12, %v209_v27  ;;  %v265_v35 = vadd.f32 %v233_v28, %v212_v25  ;;  %v263_v37 = vadd.f32 %v231_v29, %v212_v25  ;;  %v269_v55 = vadd.f32 %v237_v41, %v212_v25 }
  0xac   :  { %943 = vtanh.f32 %v266_v30  ;;  %v268_v58 = vadd.f32 %v236_v44, %v212_v25 }
  0xad   :  { %945 = vtanh.f32 %v264_v31  ;;  %v238_v39 = vperm.slane %v1336_v33, 0  ;;  %v225_v46 = vrot.slane %v1336_v33, 3  ;;  %v224_v49 = vrot.slane %v1336_v33, 2 }
  0xae   :  { %947 = vtanh.f32 %v262_v32  ;;  %v223_v52 = vrot.slane %v1336_v33, 1  ;;  %v228_v4 = vrot.slane %v1336_v33, 6  ;;  %v227_v7 = vrot.slane %v1336_v33, 5 }
  0xaf   :  { %949 = vtanh.f32 %v267_v34  ;;  %v241_v59 = vperm.slane %v225_v46, 0  ;;  %v240_v62 = vperm.slane %v224_v49, 0  ;;  %v226_v12 = vrot.slane %v1336_v33, 4 }
  0xb0   :  { %951 = vtanh.f32 %v265_v35  ;;  %v239_v0 = vperm.slane %v223_v52, 0  ;;  %v244_v15 = vperm.slane %v228_v4, 0  ;;  %v243_v19 = vperm.slane %v227_v7, 0 }
  0xb1   :  { %v1344_v42 = vld [vmem:[#allocation2 + $0x8] sm:$0xff]  ;;  %953 = vtanh.f32 %v263_v37  ;;  %v242_v21 = vperm.slane %v226_v12, 0  ;;  %v229_v29 = vrot.slane %v1336_v33, 7 }
  0xb2   :  { %v944_v43 = vpop.eup %943  ;;  %v270_v45 = vadd.f32 %v238_v39, %v1344_v42  ;;  %v273_v3 = vadd.f32 %v241_v59, %v1344_v42  ;;  %v272_v6 = vadd.f32 %v240_v62, %v1344_v42  ;;  %v271_v9 = vadd.f32 %v239_v0, %v1344_v42 }
  0xb3   :  { %v946_v47 = vpop.eup %945  ;;  %v302_v48 = vmul.f32 %v944_v43, %v1342_v40  ;;  %v276_v23 = vadd.f32 %v244_v15, %v1344_v42  ;;  %v275_v26 = vadd.f32 %v243_v19, %v1344_v42  ;;  %v274_v28 = vadd.f32 %v242_v21, %v1344_v42 }
  0xb4   :  { %v948_v50 = vpop.eup %947  ;;  %v300_v51 = vmul.f32 %v946_v47, %v1342_v40  ;;  %955 = vtanh.f32 %v270_v45  ;;  %v245_v37 = vperm.slane %v229_v29, 0 }
  0xb5   :  { %v326_v53 = vsel %vm140_vm0, %v302_v48, 0.0  ;;  %v298_v54 = vmul.f32 %v948_v50, %v1342_v40  ;;  %v950_v56 = vpop.eup %949  ;;  %957 = vtanh.f32 %v269_v55 }
  0xb6   :  { %327 = vadd.xlane.f32.xlu2 %v326_v53  ;;  %v320_v57 = vsel %vm140_vm0, %v300_v51, 0.0  ;;  %v952_v60 = vpop.eup %951  ;;  %v303_v1 = vmul.f32 %v950_v56, %v1342_v40  ;;  %959 = vtanh.f32 %v268_v58  ;;  %v277_v43 = vadd.f32 %v245_v37, %v1344_v42 }
  0xb7   :  { %321 = vadd.xlane.f32.xlu1 %v320_v57  ;;  %v314_v61 = vsel %vm140_vm0, %v298_v54, 0.0  ;;  %v954_v63 = vpop.eup %953  ;;  %v301_v2 = vmul.f32 %v952_v60, %v1342_v40  ;;  %961 = vtanh.f32 %v273_v3  ;;  %v378_v58 = vlaneseq }
  0xb8   :  { %315 = vadd.xlane.f32.xlu0 %v314_v61  ;;  %v299_v5 = vmul.f32 %v954_v63, %v1342_v40  ;;  %v329_v13 = vsel %vm140_vm0, %v303_v1, 0.0  ;;  %963 = vtanh.f32 %v272_v6 }
  0xb9   :  { %v323_v14 = vsel %vm140_vm0, %v301_v2, 0.0  ;;  %965 = vtanh.f32 %v271_v9  ;;  %v1399_v59 = vand.u32 127, %v378_v58 }
  0xba   :  { %v956_v8 = vpop.eup %955  ;;  %v317_v17 = vsel %vm140_vm0, %v299_v5, 0.0  ;;  %967 = vtanh.f32 %v276_v23 }
  0xbb   :  { %v958_v16 = vpop.eup %957  ;;  %v306_v18 = vmul.f32 %v956_v8, %v1342_v40  ;;  %969 = vtanh.f32 %v275_v26 }
  0xbc   :  { %v960_v20 = vpop.eup %959  ;;  %v305_v22 = vmul.f32 %v958_v16, %v1342_v40  ;;  %971 = vtanh.f32 %v274_v28 }
  0xbd   :  { %v304_v24 = vmul.f32 %v960_v20, %v1342_v40  ;;  %v338_v25 = vsel %vm140_vm0, %v306_v18, 0.0  ;;  %v962_v27 = vpop.eup %961  ;;  %973 = vtanh.f32 %v277_v43 }
  0xbe   :  { %330 = vadd.xlane.f32.xlu2 %v329_v13  ;;  %v964_v30 = vpop.eup %963  ;;  %v335_v32 = vsel %vm140_vm0, %v305_v22, 0.0  ;;  %v309_v35 = vmul.f32 %v962_v27, %v1342_v40 }
  0xbf   :  { %324 = vadd.xlane.f32.xlu1 %v323_v14  ;;  %v966_v31 = vpop.eup %965  ;;  %v332_v34 = vsel %vm140_vm0, %v304_v24, 0.0  ;;  %v308_v36 = vmul.f32 %v964_v30, %v1342_v40 }
  0xc0   :  { %318 = vadd.xlane.f32.xlu0 %v317_v17  ;;  %v307_v38 = vmul.f32 %v966_v31, %v1342_v40  ;;  %v347_v33 = vsel %vm140_vm0, %v309_v35, 0.0  ;;  %v968_v39 = vpop.eup %967 }
  0xc1   :  { %v344_v41 = vsel %vm140_vm0, %v308_v36, 0.0  ;;  %v970_v44 = vpop.eup %969  ;;  %v312_v47 = vmul.f32 %v968_v39, %v1342_v40 }
  0xc2   :  { %v341_v45 = vsel %vm140_vm0, %v307_v38, 0.0  ;;  %v972_v46 = vpop.eup %971  ;;  %v311_v48 = vmul.f32 %v970_v44, %v1342_v40  ;;  %v1227_v44 = vmov 0  }
  0xc3   :  { %v310_v49 = vmul.f32 %v972_v46, %v1342_v40  ;;  %v356_v50 = vsel %vm140_vm0, %v312_v47, 0.0  ;;  %v974_v52 = vpop.eup %973  ;;  %939 = vset.pattern.permute.xlu2 %v1227_v44  ;;  %938 = vset.pattern.permute.xlu1 %v1227_v44 }
  0xc4   :  { %v353_v51 = vsel %vm140_vm0, %v311_v48, 0.0  ;;  %v313_v53 = vmul.f32 %v974_v52, %v1342_v40  ;;  %937 = vset.pattern.permute.xlu0 %v1227_v44 }
  0xc5   :  { %v350_v42 = vsel %vm140_vm0, %v310_v49, 0.0 }
  0xc6   :  { %339 = vadd.xlane.f32.xlu2 %v338_v25  ;;  %v359_v54 = vsel %vm140_vm0, %v313_v53, 0.0 }
  0xc7   :  { %336 = vadd.xlane.f32.xlu1 %v335_v32 }
  0xc8   :  { %333 = vadd.xlane.f32.xlu0 %v332_v34 }
  0xce   :  { %348 = vadd.xlane.f32.xlu2 %v347_v33 }
  0xcf   :  { %345 = vadd.xlane.f32.xlu1 %v344_v41 }
  0xd0   :  { %342 = vadd.xlane.f32.xlu0 %v341_v45 }
  0xd6   :  { %357 = vadd.xlane.f32.xlu2 %v356_v50 }
  0xd7   :  { %354 = vadd.xlane.f32.xlu1 %v353_v51 }
  0xd8   :  { %351 = vadd.xlane.f32.xlu0 %v350_v42 }
  0xe0   :  { %360 = vadd.xlane.f32.xlu0 %v359_v54 }
 0x129   :  { %v1393_v55 = vpop.xlane.xlu2 %327 }
 0x12a   :  { %v1395_v56 = vpop.xlane.xlu1 %321  ;;  %v384_v4 = vperm.slane %v1393_v55, %v1399_v59 }
 0x12b   :  { %v1397_v57 = vpop.xlane.xlu0 %315  ;;  %v382_v0 = vperm.slane %v1395_v56, %v1399_v59 }
 0x12c   :  { %v380_v40 = vperm.slane %v1397_v57, %v1399_v59 }
 0x131   :  { %v1401_v60 = vpop.xlane.xlu2 %330 }
 0x132   :  { %v1403_v61 = vpop.xlane.xlu1 %324  ;;  %v385_v9 = vperm.slane %v1401_v60, %v1399_v59 }
 0x133   :  { %v319_v62 = vpop.xlane.xlu0 %318  ;;  %v383_v1 = vperm.slane %v1403_v61, %v1399_v59 }
 0x134   :  { %v381_v63 = vperm.slane %v319_v62, %v1399_v59 }
 0x136   :  { %v397_v2 = vsel %vm396_vm1, %v381_v63, %v380_v40 }
 0x137   :  { %v399_v3 = vsel %vm398_vm2, %v382_v0, %v397_v2 }
 0x138   :  { %v401_v5 = vsel %vm400_vm3, %v383_v1, %v399_v3 }
 0x139   :  { %v1417_v6 = vpop.xlane.xlu2 %339  ;;  %v403_v8 = vsel %vm402_vm4, %v384_v4, %v401_v5 }
 0x13a   :  { %v337_v7 = vpop.xlane.xlu1 %336  ;;  %v405_v15 = vsel %vm404_vm5, %v385_v9, %v403_v8  ;;  %v388_v19 = vperm.slane %v1417_v6, %v1399_v59 }
 0x13b   :  { %v387_v12 = vperm.slane %v337_v7, %v1399_v59  ;;  %v1423_v13 = vpop.xlane.xlu0 %333 }
 0x13c   :  { %v386_v14 = vperm.slane %v1423_v13, %v1399_v59 }
 0x13e   :  { %v407_v16 = vsel %vm406_vm6, %v386_v14, %v405_v15 }
 0x13f   :  { %v409_v17 = vsel %vm408_vm7, %v387_v12, %v407_v16 }
 0x140   :  { %v420_v18 = vsel %vm419_vm8, %v409_v17, -inf }
 0x141   :  { %421 = vmax.xlane.f32.xlu1 %v420_v18  ;;  %v1435_v21 = vpop.xlane.xlu2 %348 }
 0x142   :  { %v1433_v20 = vpop.xlane.xlu1 %345  ;;  %v391_v26 = vperm.slane %v1435_v21, %v1399_v59 }
 0x143   :  { %v1437_v22 = vpop.xlane.xlu0 %342  ;;  %v390_v24 = vperm.slane %v1433_v20, %v1399_v59 }
 0x144   :  { %v389_v23 = vperm.slane %v1437_v22, %v1399_v59 }
 0x146   :  { %v410_v25 = vsel %vm396_vm1, %v389_v23, %v388_v19 }
 0x147   :  { %v411_v27 = vsel %vm398_vm2, %v390_v24, %v410_v25 }
 0x148   :  { %v412_v29 = vsel %vm400_vm3, %v391_v26, %v411_v27 }
 0x149   :  { %v1456_v34 = vpop.xlane.xlu2 %357 }
 0x14a   :  { %v1447_v28 = vpop.xlane.xlu1 %354  ;;  %v394_v36 = vperm.slane %v1456_v34, %v1399_v59 }
 0x14b   :  { %v1450_v30 = vpop.xlane.xlu0 %351  ;;  %v393_v32 = vperm.slane %v1447_v28, %v1399_v59 }
 0x14c   :  { %v392_v31 = vperm.slane %v1450_v30, %v1399_v59 }
 0x14e   :  { %v413_v35 = vsel %vm402_vm4, %v392_v31, %v412_v29 }
 0x14f   :  { %v414_v37 = vsel %vm404_vm5, %v393_v32, %v413_v35 }
 0x150   :  { %v415_v33 = vsel %vm406_vm6, %v394_v36, %v414_v37 }
 0x153   :  { %v1462_v38 = vpop.xlane.xlu0 %360 }
 0x154   :  { %v395_v39 = vperm.slane %v1462_v38, %v1399_v59 }
 0x156   :  { %v416_v41 = vsel %vm408_vm7, %v395_v39, %v415_v33 }
 0x157   :  { %v423_v43 = vsel %vm419_vm8, %v416_v41, -inf }
 0x158   :  { %424 = vmax.xlane.f32.xlu2 %v423_v43 }
 0x1b4   :  { %v422_v45 = vpop.xlane.xlu1 %421 }
 0x1b5   :  { %v429_v46 = vperm.slane %v422_v45, 1  ;;  %v428_v47 = vperm.slane %v422_v45, 0  ;;  %v430_v48 = vperm.slane %v422_v45, 2  ;;  %v432_v42 = vperm.slane %v422_v45, 4 }
 0x1b6   :  { %v435_v52 = vperm.slane %v422_v45, 7  ;;  %v431_v53 = vperm.slane %v422_v45, 3  ;;  %v433_v4 = vperm.slane %v422_v45, 5 }
 0x1b7   :  { %v461_v49 = vsub.f32 %v319_v62, %v429_v46  ;;  %v460_v50 = vsub.f32 %v1397_v57, %v428_v47  ;;  %v462_v51 = vsub.f32 %v1395_v56, %v430_v48  ;;  %v464_v63 = vsub.f32 %v1393_v55, %v432_v42 }
 0x1b8   :  { %v467_v0 = vsub.f32 %v337_v7, %v435_v52  ;;  %v463_v1 = vsub.f32 %v1403_v61, %v431_v53  ;;  %v434_v62 = vperm.slane %v422_v45, 6  ;;  %v465_v61 = vsub.f32 %v1401_v60, %v433_v4 }
 0x1b9   :  { %v478_v54 = vmul.f32 1.442695, %v461_v49  ;;  %v476_v58 = vmul.f32 1.442695, %v460_v50  ;;  %v480_v40 = vmul.f32 1.442695, %v462_v51 }
 0x1ba   :  { %v484_v2 = vmul.f32 1.442695, %v464_v63  ;;  %v490_v3 = vmul.f32 1.442695, %v467_v0  ;;  %v482_v56 = vmul.f32 1.442695, %v463_v1  ;;  %v466_v55 = vsub.f32 %v1423_v13, %v434_v62 }
 0x1bb   :  { %975 = vpow2.f32 %v478_v54  ;;  %v486_v12 = vmul.f32 1.442695, %v465_v61 }
 0x1bc   :  { %977 = vpow2.f32 %v476_v58  ;;  %v488_v7 = vmul.f32 1.442695, %v466_v55 }
 0x1bd   :  { %979 = vpow2.f32 %v480_v40 }
 0x1be   :  { %981 = vpow2.f32 %v484_v2 }
 0x1bf   :  { %983 = vpow2.f32 %v490_v3 }
 0x1c0   :  { %985 = vpow2.f32 %v482_v56 }
 0x1c1   :  { %v1473_v57 = vpop.eup %975  ;;  %987 = vpow2.f32 %v488_v7 }
 0x1c2   :  { %v1475_v5 = vpop.eup %977  ;;  %528 = vperm.xlu1 %938, %v1473_v57   ;;  %989 = vpow2.f32 %v486_v12 }
 0x1c3   :  { %v1478_v8 = vpop.eup %979  ;;  %525 = vperm.xlu0 %937, %v1475_v5  }
 0x1c4   :  { %531 = vperm.xlu2 %939, %v1478_v8   ;;  %v1484_v9 = vpop.eup %981 }
 0x1c5   :  { %v1486_v14 = vpop.eup %983 }
 0x1c6   :  { %v1489_v15 = vpop.eup %985 }
 0x1c7   :  { %v1496_v31 = vpop.eup %987 }
 0x1c8   :  { %v1500_v36 = vpop.eup %989 }
 0x1ca   :  { %537 = vperm.xlu1 %938, %v1484_v9  }
 0x1cb   :  { %546 = vperm.xlu0 %937, %v1486_v14   ;;  %v425_v16 = vpop.xlane.xlu2 %424 }
 0x1cc   :  { %534 = vperm.xlu2 %939, %v1489_v15   ;;  %v438_v13 = vperm.slane %v425_v16, 2  ;;  %v437_v17 = vperm.slane %v425_v16, 1  ;;  %v436_v18 = vperm.slane %v425_v16, 0  ;;  %v441_v24 = vperm.slane %v425_v16, 5 }
 0x1cd   :  { %v440_v25 = vperm.slane %v425_v16, 4  ;;  %v439_v32 = vperm.slane %v425_v16, 3  ;;  %v443_v33 = vperm.slane %v425_v16, 7  ;;  %v442_v43 = vperm.slane %v425_v16, 6 }
 0x1ce   :  { %v470_v60 = vsub.f32 %v1433_v20, %v438_v13  ;;  %v469_v19 = vsub.f32 %v1437_v22, %v437_v17  ;;  %v468_v23 = vsub.f32 %v1417_v6, %v436_v18  ;;  %v473_v35 = vsub.f32 %v1447_v28, %v441_v24 }
 0x1cf   :  { %v472_v20 = vsub.f32 %v1450_v30, %v440_v25  ;;  %v471_v6 = vsub.f32 %v1435_v21, %v439_v32  ;;  %v475_v30 = vsub.f32 %v1462_v38, %v443_v33  ;;  %v474_v21 = vsub.f32 %v1456_v34, %v442_v43 }
 0x1d0   :  { %v496_v26 = vmul.f32 1.442695, %v470_v60  ;;  %v494_v27 = vmul.f32 1.442695, %v469_v19  ;;  %v492_v29 = vmul.f32 1.442695, %v468_v23 }
 0x1d1   :  { %v502_v22 = vmul.f32 1.442695, %v473_v35  ;;  %v500_v37 = vmul.f32 1.442695, %v472_v20  ;;  %v498_v28 = vmul.f32 1.442695, %v471_v6 }
 0x1d2   :  { %543 = vperm.xlu1 %938, %v1496_v31   ;;  %991 = vpow2.f32 %v496_v26  ;;  %v506_v45 = vmul.f32 1.442695, %v475_v30  ;;  %v504_v48 = vmul.f32 1.442695, %v474_v21 }
 0x1d3   :  { %993 = vpow2.f32 %v494_v27 }
 0x1d4   :  { %540 = vperm.xlu2 %939, %v1500_v36   ;;  %995 = vpow2.f32 %v492_v29 }
 0x1d5   :  { %997 = vpow2.f32 %v502_v22 }
 0x1d6   :  { %999 = vpow2.f32 %v500_v37 }
 0x1d7   :  { %1001 = vpow2.f32 %v498_v28 }
 0x1d8   :  { %v1505_v39 = vpop.eup %991  ;;  %1003 = vpow2.f32 %v506_v45 }
 0x1d9   :  { %v1507_v41 = vpop.eup %993  ;;  %555 = vperm.xlu0 %937, %v1505_v39   ;;  %1005 = vpow2.f32 %v504_v48 }
 0x1da   :  { %v1510_v44 = vpop.eup %995  ;;  %552 = vperm.xlu1 %938, %v1507_v41  }
 0x1db   :  { %v1516_v46 = vpop.eup %997 }
 0x1dc   :  { %549 = vperm.xlu2 %939, %v1510_v44   ;;  %v1518_v47 = vpop.eup %999 }
 0x1dd   :  { %v1522_v49 = vpop.eup %1001 }
 0x1de   :  { %v1525_v38 = vpop.eup %1003 }
 0x1df   :  { %v1528_v34 = vpop.eup %1005 }
 0x1e1   :  { %564 = vperm.xlu0 %937, %v1516_v46  }
 0x1e2   :  { %561 = vperm.xlu1 %938, %v1518_v47  }
 0x1e4   :  { %558 = vperm.xlu2 %939, %v1522_v49  }
 0x1ea   :  { %570 = vperm.xlu1 %938, %v1525_v38  }
 0x1ec   :  { %567 = vperm.xlu2 %939, %v1528_v34  }
 0x21e   :  { %v532_v50 = vpop.permute.xlu2 %531 }
 0x21f   :  { %v574_v0 = vperm.slane %v532_v50, %v1399_v59 }
 0x226   :  { %v535_v51 = vpop.permute.xlu2 %534 }
 0x227   :  { %v575_v62 = vperm.slane %v535_v51, %v1399_v59 }
 0x22e   :  { %v541_v58 = vpop.permute.xlu2 %540 }
 0x22f   :  { %v577_v55 = vperm.slane %v541_v58, %v1399_v59 }
 0x234   :  { %v529_v42 = vpop.permute.xlu1 %528 }
 0x235   :  { %v526_v52 = vpop.permute.xlu0 %525  ;;  %v573_v53 = vperm.slane %v529_v42, %v1399_v59 }
 0x236   :  { %v572_v54 = vperm.slane %v526_v52, %v1399_v59  ;;  %v550_v7 = vpop.permute.xlu2 %549 }
 0x237   :  { %v580_v25 = vperm.slane %v550_v7, %v1399_v59 }
 0x238   :  { %v588_v40 = vsel %vm396_vm1, %v573_v53, %v572_v54 }
 0x239   :  { %v589_v1 = vsel %vm398_vm2, %v574_v0, %v588_v40 }
 0x23a   :  { %v590_v3 = vsel %vm400_vm3, %v575_v62, %v589_v1 }
 0x23c   :  { %v538_v63 = vpop.permute.xlu1 %537 }
 0x23d   :  { %v576_v2 = vperm.slane %v538_v63, %v1399_v59  ;;  %v547_v4 = vpop.permute.xlu0 %546 }
 0x23e   :  { %v579_v16 = vperm.slane %v547_v4, %v1399_v59  ;;  %v559_v26 = vpop.permute.xlu2 %558 }
 0x23f   :  { %v591_v56 = vsel %vm402_vm4, %v576_v2, %v590_v3  ;;  %v583_v20 = vperm.slane %v559_v26, %v1399_v59 }
 0x240   :  { %v592_v13 = vsel %vm404_vm5, %v577_v55, %v591_v56 }
 0x244   :  { %v544_v61 = vpop.permute.xlu1 %543 }
 0x245   :  { %v578_v12 = vperm.slane %v544_v61, %v1399_v59 }
 0x246   :  { %v568_v28 = vpop.permute.xlu2 %567 }
 0x247   :  { %v593_v17 = vsel %vm406_vm6, %v578_v12, %v592_v13  ;;  %v586_v21 = vperm.slane %v568_v28, %v1399_v59 }
 0x248   :  { %v594_v18 = vsel %vm408_vm7, %v579_v16, %v593_v17 }
 0x249   :  { %v604_v60 = vsel %vm419_vm8, %v594_v18, 0.0 }
 0x24a   :  { %605 = vadd.xlane.f32.xlu0 %v604_v60 }
 0x24b   :  { %v556_v19 = vpop.permute.xlu0 %555 }
 0x24c   :  { %v553_v23 = vpop.permute.xlu1 %552  ;;  %v582_v29 = vperm.slane %v556_v19, %v1399_v59 }
 0x24d   :  { %v581_v24 = vperm.slane %v553_v23, %v1399_v59 }
 0x24f   :  { %v595_v27 = vsel %vm396_vm1, %v581_v24, %v580_v25 }
 0x250   :  { %v596_v32 = vsel %vm398_vm2, %v582_v29, %v595_v27 }
 0x251   :  { %v597_v37 = vsel %vm400_vm3, %v583_v20, %v596_v32 }
 0x253   :  { %v565_v22 = vpop.permute.xlu0 %564 }
 0x254   :  { %v562_v35 = vpop.permute.xlu1 %561  ;;  %v585_v43 = vperm.slane %v565_v22, %v1399_v59 }
 0x255   :  { %v584_v6 = vperm.slane %v562_v35, %v1399_v59 }
 0x257   :  { %v598_v33 = vsel %vm402_vm4, %v584_v6, %v597_v37 }
 0x258   :  { %v599_v30 = vsel %vm404_vm5, %v585_v43, %v598_v33 }
 0x259   :  { %v600_v50 = vsel %vm406_vm6, %v586_v21, %v599_v30 }
 0x25c   :  { %v571_v45 = vpop.permute.xlu1 %570 }
 0x25d   :  { %v587_v48 = vperm.slane %v571_v45, %v1399_v59 }
 0x25f   :  { %v601_v51 = vsel %vm408_vm7, %v587_v48, %v600_v50 }
 0x260   :  { %v607_v42 = vsel %vm419_vm8, %v601_v51, 0.0  ;;  %v809_v51 = vld [vmem:[#allocation12 + $0x18] sm:$0xff] }
 0x261   :  { %608 = vadd.xlane.f32.xlu2 %v607_v42  ;;  %v805_v42 = vld [vmem:[#allocation11 + $0x18] sm:$0xff]  ;;  %828 = vmatpush.msrb.mxu2 %v809_v51 }
 0x262   :  { %851 = vmatpush.msrb.mxu3 %v805_v42 }
 0x2bd   :  { %v606_v52 = vpop.xlane.xlu0 %605 }
 0x2be   :  { %1007 = vrcp.f32 %v606_v52  ;;  %v808_v52 = vld [vmem:[#allocation12 + $0x10] sm:$0xff] }
 0x2bf   :  { %829 = vmatpush.msrb.mxu2 %v808_v52 }
 0x2c4   :  { %v1008_v53 = vpop.eup %1007 }
 0x2c5   :  { %v621_v54 = vperm.slane %v1008_v53, 7  ;;  %v614_v58 = vperm.slane %v1008_v53, 0  ;;  %v620_v40 = vperm.slane %v1008_v53, 6  ;;  %v615_v2 = vperm.slane %v1008_v53, 1 }
 0x2c6   :  { %v616_v3 = vperm.slane %v1008_v53, 2  ;;  %v617_v61 = vperm.slane %v1008_v53, 3  ;;  %v618_v13 = vperm.slane %v1008_v53, 4 }
 0x2c7   :  { %v653_v63 = vmul.f32 %v1486_v14, %v621_v54  ;;  %v646_v0 = vmul.f32 %v1475_v5, %v614_v58  ;;  %v652_v1 = vmul.f32 %v1496_v31, %v620_v40  ;;  %v647_v62 = vmul.f32 %v1473_v57, %v615_v2  ;;  %v803_v54 = vld [vmem:[#allocation11 + $0x8] sm:$0xff] }
 0x2c8   :  { %v648_v4 = vmul.f32 %v1478_v8, %v616_v3  ;;  %v649_v12 = vmul.f32 %v1489_v15, %v617_v61  ;;  %v650_v18 = vmul.f32 %v1484_v9, %v618_v13  ;;  %v807_v40 = vld [vmem:[#allocation12 + $0x8] sm:$0xff] }
 0x2c9   :  { %694 = vperm.xlu0 %937, %v653_v63   ;;  %673 = vperm.xlu1 %938, %v646_v0  }
 0x2ca   :  { %691 = vperm.xlu2 %939, %v652_v1   ;;  %830 = vmatpush.msrb.mxu2 %v807_v40 }
 0x2d1   :  { %676 = vperm.xlu1 %938, %v647_v62  }
 0x2d4   :  { %v609_v56 = vpop.xlane.xlu2 %608 }
 0x2d5   :  { %1009 = vrcp.f32 %v609_v56 }
 0x2d9   :  { %679 = vperm.xlu1 %938, %v648_v4  }
 0x2db   :  { %v1010_v55 = vpop.eup %1009 }
 0x2dc   :  { %v626_v14 = vperm.slane %v1010_v55, 4  ;;  %v624_v7 = vperm.slane %v1010_v55, 2  ;;  %v629_v57 = vperm.slane %v1010_v55, 7  ;;  %v627_v16 = vperm.slane %v1010_v55, 5 }
 0x2dd   :  { %v622_v15 = vperm.slane %v1010_v55, 0  ;;  %v623_v19 = vperm.slane %v1010_v55, 1  ;;  %v628_v9 = vperm.slane %v1010_v55, 6 }
 0x2de   :  { %v658_v5 = vmul.f32 %v1518_v47, %v626_v14  ;;  %v656_v31 = vmul.f32 %v1505_v39, %v624_v7  ;;  %v661_v17 = vmul.f32 %v1525_v38, %v629_v57  ;;  %v659_v8 = vmul.f32 %v1516_v46, %v627_v16 }
 0x2df   :  { %v619_v47 = vperm.slane %v1008_v53, 5  ;;  %v654_v60 = vmul.f32 %v1510_v44, %v622_v15  ;;  %v655_v23 = vmul.f32 %v1507_v41, %v623_v19  ;;  %v625_v38 = vperm.slane %v1010_v55, 3  ;;  %v804_v53 = vld [vmem:[#allocation11 + $0x10] sm:$0xff]  ;;  %v802_v15 = vld [vmem:[#allocation11] sm:$0xff] }
 0x2e0   :  { %754 = vperm.xlu2 %939, %v658_v5   ;;  %748 = vperm.xlu0 %937, %v656_v31   ;;  %v660_v24 = vmul.f32 %v1528_v34, %v628_v9 }
 0x2e1   :  { %682 = vperm.xlu1 %938, %v649_v12   ;;  %v651_v39 = vmul.f32 %v1500_v36, %v619_v47  ;;  %v657_v46 = vmul.f32 %v1522_v49, %v625_v38  ;;  %852 = vmatpush.msrb.mxu3 %v804_v53 }
 0x2e3   :  { %853 = vmatpush.msrb.mxu3 %v803_v54 }
 0x2e5   :  { %854 = vmatpush.msrb.mxu3 %v802_v15 }
 0x2e8   :  { %763 = vperm.xlu2 %939, %v661_v17   ;;  %757 = vperm.xlu0 %937, %v659_v8  }
 0x2e9   :  { %685 = vperm.xlu1 %938, %v650_v18  }
 0x2f1   :  { %688 = vperm.xlu1 %938, %v651_v39   ;;  %v806_v39 = vld [vmem:[#allocation12] sm:$0xff] }
 0x2f2   :  { %831 = vmatpush.msrb.mxu2 %v806_v39 }
 0x2f9   :  { %742 = vperm.xlu1 %938, %v654_v60  }
 0x301   :  { %745 = vperm.xlu1 %938, %v655_v23  }
 0x309   :  { %751 = vperm.xlu1 %938, %v657_v46  }
 0x311   :  { %760 = vperm.xlu1 %938, %v660_v24  }
 0x324   :  { %v692_v20 = vpop.permute.xlu2 %691 }
 0x325   :  { %v702_v43 = vperm.slane %v692_v20, %v1399_v59 }
 0x33a   :  { %v755_v2 = vpop.permute.xlu2 %754 }
 0x33b   :  { %v674_v25 = vpop.permute.xlu1 %673  ;;  %v695_v34 = vpop.permute.xlu0 %694  ;;  %v769_v7 = vperm.slane %v755_v2, %v1399_v59 }
 0x33c   :  { %v696_v41 = vperm.slane %v674_v25, %v1399_v59  ;;  %v703_v21 = vperm.slane %v695_v34, %v1399_v59 }
 0x342   :  { %v764_v31 = vpop.permute.xlu2 %763 }
 0x343   :  { %v677_v26 = vpop.permute.xlu1 %676  ;;  %v772_v17 = vperm.slane %v764_v31, %v1399_v59 }
 0x344   :  { %v697_v44 = vperm.slane %v677_v26, %v1399_v59 }
 0x346   :  { %v704_v6 = vsel %vm396_vm1, %v697_v44, %v696_v41 }
 0x34b   :  { %v680_v36 = vpop.permute.xlu1 %679 }
 0x34c   :  { %v698_v32 = vperm.slane %v680_v36, %v1399_v59 }
 0x34e   :  { %v705_v22 = vsel %vm398_vm2, %v698_v32, %v704_v6 }
 0x352   :  { %v749_v0 = vpop.permute.xlu0 %748 }
 0x353   :  { %v683_v27 = vpop.permute.xlu1 %682  ;;  %v767_v4 = vperm.slane %v749_v0, %v1399_v59 }
 0x354   :  { %v699_v35 = vperm.slane %v683_v27, %v1399_v59 }
 0x356   :  { %v706_v33 = vsel %vm400_vm3, %v699_v35, %v705_v22 }
 0x35a   :  { %v758_v5 = vpop.permute.xlu0 %757 }
 0x35b   :  { %v686_v29 = vpop.permute.xlu1 %685  ;;  %v770_v57 = vperm.slane %v758_v5, %v1399_v59 }
 0x35c   :  { %v700_v49 = vperm.slane %v686_v29, %v1399_v59 }
 0x35e   :  { %v707_v30 = vsel %vm402_vm4, %v700_v49, %v706_v33 }
 0x363   :  { %v689_v37 = vpop.permute.xlu1 %688 }
 0x364   :  { %v701_v28 = vperm.slane %v689_v37, %v1399_v59 }
 0x366   :  { %v708_v45 = vsel %vm404_vm5, %v701_v28, %v707_v30 }
 0x367   :  { %v709_v48 = vsel %vm406_vm6, %v702_v43, %v708_v45 }
 0x368   :  { %v710_v50 = vsel %vm408_vm7, %v703_v21, %v709_v48 }
 0x369   :  { %920 = vmatmul.msk.f32.vlgmr.msra.gmra.mxu2 %vm419_vm8, %v710_v50  ;;  %874 = vst.msk [vmem:[#allocation15] sm:$0xff] %vm419_vm8, %v710_v50 }
 0x36b   :  { %v743_v58 = vpop.permute.xlu1 %742 }
 0x36c   :  { %v765_v62 = vperm.slane %v743_v58, %v1399_v59 }
 0x373   :  { %v746_v63 = vpop.permute.xlu1 %745 }
 0x374   :  { %v766_v1 = vperm.slane %v746_v63, %v1399_v59 }
 0x376   :  { %v773_v3 = vsel %vm396_vm1, %v766_v1, %v765_v62 }
 0x377   :  { %v774_v61 = vsel %vm398_vm2, %v767_v4, %v773_v3 }
 0x37b   :  { %v752_v56 = vpop.permute.xlu1 %751 }
 0x37c   :  { %v768_v55 = vperm.slane %v752_v56, %v1399_v59 }
 0x37e   :  { %v775_v14 = vsel %vm400_vm3, %v768_v55, %v774_v61 }
 0x37f   :  { %v776_v12 = vsel %vm402_vm4, %v769_v7, %v775_v14 }
 0x380   :  { %v777_v8 = vsel %vm404_vm5, %v770_v57, %v776_v12 }
 0x383   :  { %v761_v16 = vpop.permute.xlu1 %760 }
 0x384   :  { %v771_v13 = vperm.slane %v761_v16, %v1399_v59 }
 0x386   :  { %v778_v18 = vsel %vm406_vm6, %v771_v13, %v777_v8 }
 0x387   :  { %v779_v47 = vsel %vm408_vm7, %v772_v17, %v778_v18 }
 0x388   :  { %921 = vmatmul.msk.f32.vlgmr.msra.gmra.mxu3 %vm419_vm8, %v779_v47  ;;  %875 = vst.msk [vmem:[#allocation15 + $0x8] sm:$0xff] %vm419_vm8, %v779_v47 }
 0x389   :  { %901 = dma.vmem_to_hbm [thread:$0]  %s894_s24, 256, %s896_s1, [#allocation16], %s1220_s21, %s1220_s21, %s1221_s22  }
 0x390   :  { %924 = vmatmul.msk.f32.vlgmr.msrb.gmra.mxu3 %vm140_vm0, %v1321_v10 }
 0x398   :  { %925 = vmatmul.msk.f32.gmra.mxu3 %vm140_vm0, %v1326_v11  ;;  %v942_v11 = vld [vmem:[%s1644_s8] ss:$0 sm:$0xff] }
 0x3ec   :  { %v730_v59 = vpop.f32.mrf.mxu2 }
 0x3ed   :  { %922 = vmatmul.msk.f32.vlgmr.msrb.gmra.mxu2 %vm140_vm0, %v730_v59 }
 0x40b   :  { %v799_v60 = vpop.f32.mrf.mxu3 }
 0x40c   :  { %923 = vmatmul.msk.f32.gmra.mxu2 %vm140_vm0, %v799_v60 }
 0x413   :  { %v856_v10 = vpop.f32.mrf.mxu3 }
 0x41b   :  { %v859_v9 = vpop.f32.mrf.mxu3 }
 0x470   :  { %v833_v19 = vpop.f32.mrf.mxu2 }
 0x471   :  { %v857_v23 = vadd.f32 %v856_v10, %v833_v19 }
 0x473   :  { %v866_v38 = vadd.f32 %v942_v11, %v857_v23 }
 0x475   :  { %1011 = vtanh.f32 %v866_v38 }
 0x47b   :  { %v1012_v46 = vpop.eup %1011 }
 0x47c   :  { %870 = vst.msk [vmem:[#allocation14] sm:$0xff] %vm140_vm0, %v1012_v46 }
 0x48f   :  { %v836_v24 = vpop.f32.mrf.mxu2 }
 0x490   :  { %v860_v25 = vadd.f32 %v859_v9, %v836_v24 }
 0x492   :  { %v867_v26 = vadd.f32 %v942_v11, %v860_v25 }
 0x494   :  { %1013 = vtanh.f32 %v867_v26 }
 0x49a   :  { %v1014_v36 = vpop.eup %1013 }
 0x49b   :  { %871 = vst.msk [vmem:[#allocation14 + $0x8] sm:$0xff] %vm140_vm0, %v1014_v36 }
 0x49c   :  { %888 = dma.vmem_to_hbm [thread:$0]  %s881_s28, 256, %s883_s11, [#allocation5], %s1220_s21, %s1220_s21, %s1221_s22  }
 0x49d   :  { %1215 = dma.done.wait [#allocation5], 256  }
 0x49e   :  { %1216 = vsyncadd [#allocation5], 4294967040 }
 0x49f   :  { %1217 = dma.done.wait [#allocation16], 256  }
 0x4a0   :  { %1218 = vsyncadd [#allocation16], 4294967040 }
 0x4a1   :  { %910 = vsyncpa [#allocation4], 1 }
 0x4a2   :  { %911 = vsyncpa [#allocation7], 1 }
 0x4a3   :  { %912 = vsyncpa [#allocation10], 1 }
 0x4a4   :  { %913 = vsyncpa [#allocation13], 1 }
 0x4a5   :  { %914 = vsyncpa [#allocation5], 1 }
 0x4a6   :  { %915 = vsyncpa [#allocation16], 1 }

</bundles_post_ra>
